<compile_context>
chip_gen: v7x
topology: tpu7x:2x2x1
jax: 0.10.0
libtpu: 0.0.40
codegen_flags: <defaults>
</compile_context>

<pallas_src>
import functools

import jax
import jax.numpy as jnp
import numpy as np
from jax.experimental import pallas as pl
from jax.experimental.pallas import tpu as pltpu

BN_EPS = 1e-5
LANE = 128


def _round_up(x, m):
    return (x + m - 1) // m * m


def _elu(x):
    # ELU(alpha=1): x if x > 0 else exp(x) - 1   (exp goes to the EUP slot)
    return jnp.where(x > 0, x, jnp.exp(x) - 1.0)


def _bn_feature_1pass(x, gamma, beta, n_rows):
    # BatchNorm1d(H) on (N, H), training-mode batch statistics, one sweep:
    # var = E[x^2] - E[x]^2, f32 accumulation, clamped at 0.
    inv_n = 1.0 / float(n_rows)
    s = jnp.sum(x, axis=0, keepdims=True)
    sq = jnp.sum(x * x, axis=0, keepdims=True)
    mean = s * inv_n
    var = jnp.maximum(sq * inv_n - mean * mean, 0.0)
    return gamma * (x - mean) * jax.lax.rsqrt(var + BN_EPS) + beta


def latent_decoder_kernel(x_ref,
                          w_in_ref, b_in_ref,
                          w1_ref, b1_ref, g1_ref, be1_ref,
                          w2_ref, b2_ref, g2_ref, be2_ref,
                          w3_ref, b3_ref, g3_ref, be3_ref,
                          wp_ref, bp_ref,
                          gp_ref, bep_ref,
                          out_ref, *, n_valid_out):
    n_rows = x_ref.shape[0]
    bf16 = jnp.bfloat16

    # Fused fc_z + fc_c: single matmul on the concatenated [z | c] input.
    x = x_ref[...]                                           # (N, Kp) bf16
    h0 = jnp.dot(x, w_in_ref[...],
                 preferred_element_type=jnp.float32) + b_in_ref[...]
    o = _elu(h0)
    init_x = o

    # ResNet layers 0 / 1.
    h = jnp.dot(o.astype(bf16), w1_ref[...],
                preferred_element_type=jnp.float32) + b1_ref[...]
    h = _elu(_bn_feature_1pass(h, g1_ref[...], be1_ref[...], n_rows))
    h = jnp.dot(h.astype(bf16), w2_ref[...],
                preferred_element_type=jnp.float32) + b2_ref[...]
    h = _elu(_bn_feature_1pass(h, g2_ref[...], be2_ref[...], n_rows))

    # ResNet layer 2 (residual add before the final ELU).
    h = jnp.dot(h.astype(bf16), w3_ref[...],
                preferred_element_type=jnp.float32) + b3_ref[...]
    h = _bn_feature_1pass(h, g3_ref[...], be3_ref[...], n_rows)
    h = _elu(h + init_x)

    # post_fc.
    p = jnp.dot(h.astype(bf16), wp_ref[...],
                preferred_element_type=jnp.float32) + bp_ref[...]

    # post_bn = BatchNorm1d(1) applied to (N, 1, 2*z_dim): one channel, so the
    # statistics run over every *valid* element of p.  The padded output
    # columns are exactly zero (zero-padded weights/bias), so plain full sums
    # equal the valid sums; only the divisor uses the true element count.
    count = float(n_rows * n_valid_out)
    mean = jnp.sum(p) / count
    var = jnp.maximum(jnp.sum(p * p) / count - mean * mean, 0.0)
    gamma = gp_ref[0, 0]           # scalar affine params from SMEM
    beta = bep_ref[0, 0]
    out_ref[...] = gamma * (p - mean) * jax.lax.rsqrt(var + BN_EPS) + beta
    # TODO(synk): BatchNorm running-stat updates (module state) are not
    # produced; only the forward output is computed.


def latent_decoder_forward(z, c, params, *, batch_size, sample_size,
                           z_dim, hidden_dim, c_dim):
    N = batch_size * sample_size
    K = z_dim + c_dim
    Dout = 2 * z_dim
    Kp = _round_up(K, LANE)
    Hp = _round_up(hidden_dim, LANE)
    Dp = _round_up(Dout, LANE)

    f32, bf16 = jnp.float32, jnp.bfloat16

    # Fused entry input: [z | broadcast(c)] -> (N, K), lane-padded, bf16.
    # (fc_c(c) then expand == fc_c(expand(c)); the broadcast is wrapper glue.
    #  For very large sample_size one would instead keep c at (B, c_dim) and
    #  broadcast the (B, H) fc_c result in-kernel to cut fc_c traffic by S.)
    z2 = z.astype(f32).reshape(N, z_dim)
    c_exp = jnp.broadcast_to(
        c.astype(f32).reshape(batch_size, 1, c_dim),
        (batch_size, sample_size, c_dim)).reshape(N, c_dim)
    xin = jnp.concatenate([z2, c_exp], axis=1)
    xin = jnp.pad(xin, ((0, 0), (0, Kp - K))).astype(bf16)

    def pad2(a, rows, cols):
        a = a.astype(f32)
        return jnp.pad(a, ((0, rows - a.shape[0]), (0, cols - a.shape[1])))

    # Fused fc weight / bias: [Wz; Wc] stacked along K, bz + bc folded.
    w_in = pad2(jnp.concatenate([params["wz"], params["wc"]], axis=0),
                Kp, Hp).astype(bf16)
    b_in = pad2(params["bz"] + params["bc"], 1, Hp)

    flat = [w_in, b_in]
    for i in range(1, 4):
        flat += [pad2(params[f"w{i}"], Hp, Hp).astype(bf16),
                 pad2(params[f"b{i}"], 1, Hp),
                 pad2(params[f"g{i}"], 1, Hp),
                 pad2(params[f"be{i}"], 1, Hp)]
    flat += [pad2(params["wp"], Hp, Dp).astype(bf16),
             pad2(params["bp"], 1, Dp)]

    # Scalar post_bn affine -> SMEM.
    smem_args = [params["gp"].astype(f32).reshape(1, 1),
                 params["bep"].astype(f32).reshape(1, 1)]

    vmem_spec = pl.BlockSpec(memory_space=pltpu.MemorySpace.VMEM)
    smem_spec = pl.BlockSpec(memory_space=pltpu.MemorySpace.SMEM)

    out = pl.pallas_call(
        functools.partial(latent_decoder_kernel, n_valid_out=Dout),
        out_shape=jax.ShapeDtypeStruct((N, Dp), f32),   # lane-dense (Dp=128k)
        in_specs=[vmem_spec] * (1 + len(flat)) + [smem_spec] * len(smem_args),
        out_specs=vmem_spec,
    )(xin, *flat, *smem_args)

    # Padded columns [Dout:] are scratch; slice off mu / logvar.
    return out[:, :z_dim], out[:, z_dim:Dout]


def init_params(key, z_dim, c_dim, hidden_dim):
    ks = jax.random.split(key, 8)

    def lin(k, din, dout):
        kw, kb = jax.random.split(k)
        w = jax.random.normal(kw, (din, dout), jnp.float32) / jnp.sqrt(float(din))
        b = jax.random.normal(kb, (1, dout), jnp.float32) * 0.01
        return w, b

    p = {}
    p["wz"], p["bz"] = lin(ks[0], z_dim, hidden_dim)
    p["wc"], p["bc"] = lin(ks[1], c_dim, hidden_dim)
    for i in range(1, 4):
        w, b = lin(ks[1 + i], hidden_dim, hidden_dim)
        p[f"w{i}"], p[f"b{i}"] = w, b
        p[f"g{i}"] = jnp.ones((1, hidden_dim), jnp.float32)
        p[f"be{i}"] = jnp.zeros((1, hidden_dim), jnp.float32)
    p["wp"], p["bp"] = lin(ks[5], hidden_dim, 2 * z_dim)
    p["gp"] = jnp.ones((1, 1), jnp.float32)
    p["bep"] = jnp.zeros((1, 1), jnp.float32)
    return p


def _bn_feature_ref(x, gamma, beta):
    mean = jnp.mean(x, axis=0, keepdims=True)
    var = jnp.mean((x - mean) ** 2, axis=0, keepdims=True)
    return gamma * (x - mean) * jax.lax.rsqrt(var + BN_EPS) + beta


def reference_forward(z, c, p, B, S, Zd, H, Cd, matmul_dtype=jnp.float32):
    """Pure-JAX mirror of the PyTorch forward (training-mode batch norm).

    matmul_dtype=jnp.bfloat16 mirrors the kernel's bf16-operand / f32-accum
    matmuls; jnp.float32 gives the strict f32 semantics.
    """
    N = B * S

    def mm(a, w):
        return jnp.dot(a.astype(matmul_dtype), w.astype(matmul_dtype),
                       preferred_element_type=jnp.float32)

    x = z.astype(jnp.float32).reshape(N, Zd)
    zh = mm(x, p["wz"]) + p["bz"]
    ch_b = mm(c.astype(jnp.float32), p["wc"]) + p["bc"]          # (B, H)
    ch = jnp.broadcast_to(ch_b[:, None, :], (B, S, H)).reshape(N, H)
    o = _elu(zh + ch)
    init_x = o
    h = o
    for i in range(1, 4):
        h = mm(h, p[f"w{i}"]) + p[f"b{i}"]
        h = _bn_feature_ref(h, p[f"g{i}"], p[f"be{i}"])
        h = _elu(h) if i < 3 else _elu(h + init_x)
    pr = mm(h, p["wp"]) + p["bp"]
    mean = jnp.mean(pr)
    var = jnp.mean((pr - mean) ** 2)
    pr = p["gp"][0, 0] * (pr - mean) * jax.lax.rsqrt(var + BN_EPS) + p["bep"][0, 0]
    return pr[:, :Zd], pr[:, Zd:]


if __name__ == "__main__":
    # Small shapes consistent with the module's forward.
    B, S, Zd, H, Cd = 2, 4, 16, 32, 64

    key = jax.random.PRNGKey(0)
    kz, kc, kp = jax.random.split(key, 3)
    z = jax.random.normal(kz, (B, S, Zd), jnp.float32)
    c = jax.random.normal(kc, (B, Cd), jnp.float32)
    params = init_params(kp, Zd, Cd, H)

    mu, logvar = latent_decoder_forward(
        z, c, params, batch_size=B, sample_size=S,
        z_dim=Zd, hidden_dim=H, c_dim=Cd)
    jax.block_until_ready((mu, logvar))

    # Structural check: reference with the same bf16-operand matmuls.
    mu_bf, lv_bf = reference_forward(z, c, params, B, S, Zd, H, Cd,
                                     matmul_dtype=jnp.bfloat16)
    np.testing.assert_allclose(np.asarray(mu), np.asarray(mu_bf),
                               rtol=2e-2, atol=2e-2)
    np.testing.assert_allclose(np.asarray(logvar), np.asarray(lv_bf),
                               rtol=2e-2, atol=2e-2)

    # Semantic sanity vs. strict f32 math (tolerance set by the bf16 matmuls).
    mu_f32, lv_f32 = reference_forward(z, c, params, B, S, Zd, H, Cd,
                                       matmul_dtype=jnp.float32)
    np.testing.assert_allclose(np.asarray(mu), np.asarray(mu_f32),
                               rtol=1e-1, atol=1e-1)
    np.testing.assert_allclose(np.asarray(logvar), np.asarray(lv_f32),
                               rtol=1e-1, atol=1e-1)

    print("KERNEL_OK")
</pallas_src>

<mosaic_0001>
module attributes {stable_mosaic.version = 11 : i64} {
  func.func @latent_decoder_kernel(%arg0: memref<8x128xbf16, #tpu.memory_space<vmem>>, %arg1: memref<128x128xbf16, #tpu.memory_space<vmem>>, %arg2: memref<1x128xf32, #tpu.memory_space<vmem>>, %arg3: memref<128x128xbf16, #tpu.memory_space<vmem>>, %arg4: memref<1x128xf32, #tpu.memory_space<vmem>>, %arg5: memref<1x128xf32, #tpu.memory_space<vmem>>, %arg6: memref<1x128xf32, #tpu.memory_space<vmem>>, %arg7: memref<128x128xbf16, #tpu.memory_space<vmem>>, %arg8: memref<1x128xf32, #tpu.memory_space<vmem>>, %arg9: memref<1x128xf32, #tpu.memory_space<vmem>>, %arg10: memref<1x128xf32, #tpu.memory_space<vmem>>, %arg11: memref<128x128xbf16, #tpu.memory_space<vmem>>, %arg12: memref<1x128xf32, #tpu.memory_space<vmem>>, %arg13: memref<1x128xf32, #tpu.memory_space<vmem>>, %arg14: memref<1x128xf32, #tpu.memory_space<vmem>>, %arg15: memref<128x128xbf16, #tpu.memory_space<vmem>>, %arg16: memref<1x128xf32, #tpu.memory_space<vmem>>, %arg17: memref<1x1xf32, #tpu.memory_space<smem>>, %arg18: memref<1x1xf32, #tpu.memory_space<smem>>, %arg19: memref<8x128xf32, #tpu.memory_space<vmem>>) attributes {dimension_semantics = [], scalar_prefetch = 0 : i64, scratch_operands = 0 : i64, tpu.core_type = #tpu.core_type<tc>} {
    %c0 = arith.constant 0 : index
    %c0_0 = arith.constant 0 : index
    %0 = vector.load %arg0[%c0, %c0_0] : memref<8x128xbf16, #tpu.memory_space<vmem>>, vector<8x128xbf16>
    %c0_1 = arith.constant 0 : index
    %c0_2 = arith.constant 0 : index
    %1 = vector.load %arg1[%c0_1, %c0_2] : memref<128x128xbf16, #tpu.memory_space<vmem>>, vector<128x128xbf16>
    %cst = arith.constant dense<0.000000e+00> : vector<8x128xf32>
    %2 = tpu.matmul %0, %1, %cst {dimension_numbers = #tpu.dot_dimension_numbers<[1], [0], [0], [1], [0, 0, 1, 1], [], []>} : vector<8x128xbf16>, vector<128x128xbf16>, vector<8x128xf32> -> vector<8x128xf32>
    %c0_3 = arith.constant 0 : index
    %c0_4 = arith.constant 0 : index
    %3 = vector.load %arg2[%c0_3, %c0_4] : memref<1x128xf32, #tpu.memory_space<vmem>>, vector<1x128xf32>
    %4 = vector.broadcast %3 : vector<1x128xf32> to vector<8x128xf32>
    %5 = arith.addf %2, %4 : vector<8x128xf32>
    %cst_5 = arith.constant 0.000000e+00 : f32
    %6 = vector.broadcast %cst_5 : f32 to vector<8x128xf32>
    %7 = arith.cmpf ogt, %5, %6 : vector<8x128xf32>
    %8 = math.exp %5 : vector<8x128xf32>
    %cst_6 = arith.constant 1.000000e+00 : f32
    %9 = vector.broadcast %cst_6 : f32 to vector<8x128xf32>
    %10 = arith.subf %8, %9 : vector<8x128xf32>
    %11 = arith.select %7, %5, %10 : vector<8x128xi1>, vector<8x128xf32>
    %12 = arith.truncf %11 : vector<8x128xf32> to vector<8x128xbf16>
    %c0_7 = arith.constant 0 : index
    %c0_8 = arith.constant 0 : index
    %13 = vector.load %arg3[%c0_7, %c0_8] : memref<128x128xbf16, #tpu.memory_space<vmem>>, vector<128x128xbf16>
    %cst_9 = arith.constant dense<0.000000e+00> : vector<8x128xf32>
    %14 = tpu.matmul %12, %13, %cst_9 {dimension_numbers = #tpu.dot_dimension_numbers<[1], [0], [0], [1], [0, 0, 1, 1], [], []>} : vector<8x128xbf16>, vector<128x128xbf16>, vector<8x128xf32> -> vector<8x128xf32>
    %c0_10 = arith.constant 0 : index
    %c0_11 = arith.constant 0 : index
    %15 = vector.load %arg4[%c0_10, %c0_11] : memref<1x128xf32, #tpu.memory_space<vmem>>, vector<1x128xf32>
    %16 = vector.broadcast %15 : vector<1x128xf32> to vector<8x128xf32>
    %17 = arith.addf %14, %16 : vector<8x128xf32>
    %c0_12 = arith.constant 0 : index
    %c0_13 = arith.constant 0 : index
    %18 = vector.load %arg5[%c0_12, %c0_13] : memref<1x128xf32, #tpu.memory_space<vmem>>, vector<1x128xf32>
    %c0_14 = arith.constant 0 : index
    %c0_15 = arith.constant 0 : index
    %19 = vector.load %arg6[%c0_14, %c0_15] : memref<1x128xf32, #tpu.memory_space<vmem>>, vector<1x128xf32>
    %cst_16 = arith.constant dense<0.000000e+00> : vector<128xf32>
    %20 = vector.multi_reduction <add>, %17, %cst_16 [0] : vector<8x128xf32> to vector<128xf32>
    %21 = vector.shape_cast %20 : vector<128xf32> to vector<1x128xf32>
    %22 = arith.mulf %17, %17 : vector<8x128xf32>
    %cst_17 = arith.constant dense<0.000000e+00> : vector<128xf32>
    %23 = vector.multi_reduction <add>, %22, %cst_17 [0] : vector<8x128xf32> to vector<128xf32>
    %24 = vector.shape_cast %23 : vector<128xf32> to vector<1x128xf32>
    %cst_18 = arith.constant 1.250000e-01 : f32
    %25 = vector.broadcast %cst_18 : f32 to vector<1x128xf32>
    %26 = arith.mulf %21, %25 : vector<1x128xf32>
    %cst_19 = arith.constant 1.250000e-01 : f32
    %27 = vector.broadcast %cst_19 : f32 to vector<1x128xf32>
    %28 = arith.mulf %24, %27 : vector<1x128xf32>
    %29 = arith.mulf %26, %26 : vector<1x128xf32>
    %30 = arith.subf %28, %29 : vector<1x128xf32>
    %cst_20 = arith.constant 0.000000e+00 : f32
    %31 = vector.broadcast %cst_20 : f32 to vector<1x128xf32>
    %32 = arith.maximumf %30, %31 : vector<1x128xf32>
    %33 = vector.broadcast %26 : vector<1x128xf32> to vector<8x128xf32>
    %34 = arith.subf %17, %33 : vector<8x128xf32>
    %35 = vector.broadcast %18 : vector<1x128xf32> to vector<8x128xf32>
    %36 = arith.mulf %35, %34 : vector<8x128xf32>
    %cst_21 = arith.constant 9.99999974E-6 : f32
    %37 = vector.broadcast %cst_21 : f32 to vector<1x128xf32>
    %38 = arith.addf %32, %37 : vector<1x128xf32>
    %39 = math.rsqrt %38 : vector<1x128xf32>
    %40 = vector.broadcast %39 : vector<1x128xf32> to vector<8x128xf32>
    %41 = arith.mulf %36, %40 : vector<8x128xf32>
    %42 = vector.broadcast %19 : vector<1x128xf32> to vector<8x128xf32>
    %43 = arith.addf %41, %42 : vector<8x128xf32>
    %cst_22 = arith.constant 0.000000e+00 : f32
    %44 = vector.broadcast %cst_22 : f32 to vector<8x128xf32>
    %45 = arith.cmpf ogt, %43, %44 : vector<8x128xf32>
    %46 = math.exp %43 : vector<8x128xf32>
    %cst_23 = arith.constant 1.000000e+00 : f32
    %47 = vector.broadcast %cst_23 : f32 to vector<8x128xf32>
    %48 = arith.subf %46, %47 : vector<8x128xf32>
    %49 = arith.select %45, %43, %48 : vector<8x128xi1>, vector<8x128xf32>
    %50 = arith.truncf %49 : vector<8x128xf32> to vector<8x128xbf16>
    %c0_24 = arith.constant 0 : index
    %c0_25 = arith.constant 0 : index
    %51 = vector.load %arg7[%c0_24, %c0_25] : memref<128x128xbf16, #tpu.memory_space<vmem>>, vector<128x128xbf16>
    %cst_26 = arith.constant dense<0.000000e+00> : vector<8x128xf32>
    %52 = tpu.matmul %50, %51, %cst_26 {dimension_numbers = #tpu.dot_dimension_numbers<[1], [0], [0], [1], [0, 0, 1, 1], [], []>} : vector<8x128xbf16>, vector<128x128xbf16>, vector<8x128xf32> -> vector<8x128xf32>
    %c0_27 = arith.constant 0 : index
    %c0_28 = arith.constant 0 : index
    %53 = vector.load %arg8[%c0_27, %c0_28] : memref<1x128xf32, #tpu.memory_space<vmem>>, vector<1x128xf32>
    %54 = vector.broadcast %53 : vector<1x128xf32> to vector<8x128xf32>
    %55 = arith.addf %52, %54 : vector<8x128xf32>
    %c0_29 = arith.constant 0 : index
    %c0_30 = arith.constant 0 : index
    %56 = vector.load %arg9[%c0_29, %c0_30] : memref<1x128xf32, #tpu.memory_space<vmem>>, vector<1x128xf32>
    %c0_31 = arith.constant 0 : index
    %c0_32 = arith.constant 0 : index
    %57 = vector.load %arg10[%c0_31, %c0_32] : memref<1x128xf32, #tpu.memory_space<vmem>>, vector<1x128xf32>
    %cst_33 = arith.constant dense<0.000000e+00> : vector<128xf32>
    %58 = vector.multi_reduction <add>, %55, %cst_33 [0] : vector<8x128xf32> to vector<128xf32>
    %59 = vector.shape_cast %58 : vector<128xf32> to vector<1x128xf32>
    %60 = arith.mulf %55, %55 : vector<8x128xf32>
    %cst_34 = arith.constant dense<0.000000e+00> : vector<128xf32>
    %61 = vector.multi_reduction <add>, %60, %cst_34 [0] : vector<8x128xf32> to vector<128xf32>
    %62 = vector.shape_cast %61 : vector<128xf32> to vector<1x128xf32>
    %cst_35 = arith.constant 1.250000e-01 : f32
    %63 = vector.broadcast %cst_35 : f32 to vector<1x128xf32>
    %64 = arith.mulf %59, %63 : vector<1x128xf32>
    %cst_36 = arith.constant 1.250000e-01 : f32
    %65 = vector.broadcast %cst_36 : f32 to vector<1x128xf32>
    %66 = arith.mulf %62, %65 : vector<1x128xf32>
    %67 = arith.mulf %64, %64 : vector<1x128xf32>
    %68 = arith.subf %66, %67 : vector<1x128xf32>
    %cst_37 = arith.constant 0.000000e+00 : f32
    %69 = vector.broadcast %cst_37 : f32 to vector<1x128xf32>
    %70 = arith.maximumf %68, %69 : vector<1x128xf32>
    %71 = vector.broadcast %64 : vector<1x128xf32> to vector<8x128xf32>
    %72 = arith.subf %55, %71 : vector<8x128xf32>
    %73 = vector.broadcast %56 : vector<1x128xf32> to vector<8x128xf32>
    %74 = arith.mulf %73, %72 : vector<8x128xf32>
    %cst_38 = arith.constant 9.99999974E-6 : f32
    %75 = vector.broadcast %cst_38 : f32 to vector<1x128xf32>
    %76 = arith.addf %70, %75 : vector<1x128xf32>
    %77 = math.rsqrt %76 : vector<1x128xf32>
    %78 = vector.broadcast %77 : vector<1x128xf32> to vector<8x128xf32>
    %79 = arith.mulf %74, %78 : vector<8x128xf32>
    %80 = vector.broadcast %57 : vector<1x128xf32> to vector<8x128xf32>
    %81 = arith.addf %79, %80 : vector<8x128xf32>
    %cst_39 = arith.constant 0.000000e+00 : f32
    %82 = vector.broadcast %cst_39 : f32 to vector<8x128xf32>
    %83 = arith.cmpf ogt, %81, %82 : vector<8x128xf32>
    %84 = math.exp %81 : vector<8x128xf32>
    %cst_40 = arith.constant 1.000000e+00 : f32
    %85 = vector.broadcast %cst_40 : f32 to vector<8x128xf32>
    %86 = arith.subf %84, %85 : vector<8x128xf32>
    %87 = arith.select %83, %81, %86 : vector<8x128xi1>, vector<8x128xf32>
    %88 = arith.truncf %87 : vector<8x128xf32> to vector<8x128xbf16>
    %c0_41 = arith.constant 0 : index
    %c0_42 = arith.constant 0 : index
    %89 = vector.load %arg11[%c0_41, %c0_42] : memref<128x128xbf16, #tpu.memory_space<vmem>>, vector<128x128xbf16>
    %cst_43 = arith.constant dense<0.000000e+00> : vector<8x128xf32>
    %90 = tpu.matmul %88, %89, %cst_43 {dimension_numbers = #tpu.dot_dimension_numbers<[1], [0], [0], [1], [0, 0, 1, 1], [], []>} : vector<8x128xbf16>, vector<128x128xbf16>, vector<8x128xf32> -> vector<8x128xf32>
    %c0_44 = arith.constant 0 : index
    %c0_45 = arith.constant 0 : index
    %91 = vector.load %arg12[%c0_44, %c0_45] : memref<1x128xf32, #tpu.memory_space<vmem>>, vector<1x128xf32>
    %92 = vector.broadcast %91 : vector<1x128xf32> to vector<8x128xf32>
    %93 = arith.addf %90, %92 : vector<8x128xf32>
    %c0_46 = arith.constant 0 : index
    %c0_47 = arith.constant 0 : index
    %94 = vector.load %arg13[%c0_46, %c0_47] : memref<1x128xf32, #tpu.memory_space<vmem>>, vector<1x128xf32>
    %c0_48 = arith.constant 0 : index
    %c0_49 = arith.constant 0 : index
    %95 = vector.load %arg14[%c0_48, %c0_49] : memref<1x128xf32, #tpu.memory_space<vmem>>, vector<1x128xf32>
    %cst_50 = arith.constant dense<0.000000e+00> : vector<128xf32>
    %96 = vector.multi_reduction <add>, %93, %cst_50 [0] : vector<8x128xf32> to vector<128xf32>
    %97 = vector.shape_cast %96 : vector<128xf32> to vector<1x128xf32>
    %98 = arith.mulf %93, %93 : vector<8x128xf32>
    %cst_51 = arith.constant dense<0.000000e+00> : vector<128xf32>
    %99 = vector.multi_reduction <add>, %98, %cst_51 [0] : vector<8x128xf32> to vector<128xf32>
    %100 = vector.shape_cast %99 : vector<128xf32> to vector<1x128xf32>
    %cst_52 = arith.constant 1.250000e-01 : f32
    %101 = vector.broadcast %cst_52 : f32 to vector<1x128xf32>
    %102 = arith.mulf %97, %101 : vector<1x128xf32>
    %cst_53 = arith.constant 1.250000e-01 : f32
    %103 = vector.broadcast %cst_53 : f32 to vector<1x128xf32>
    %104 = arith.mulf %100, %103 : vector<1x128xf32>
    %105 = arith.mulf %102, %102 : vector<1x128xf32>
    %106 = arith.subf %104, %105 : vector<1x128xf32>
    %cst_54 = arith.constant 0.000000e+00 : f32
    %107 = vector.broadcast %cst_54 : f32 to vector<1x128xf32>
    %108 = arith.maximumf %106, %107 : vector<1x128xf32>
    %109 = vector.broadcast %102 : vector<1x128xf32> to vector<8x128xf32>
    %110 = arith.subf %93, %109 : vector<8x128xf32>
    %111 = vector.broadcast %94 : vector<1x128xf32> to vector<8x128xf32>
    %112 = arith.mulf %111, %110 : vector<8x128xf32>
    %cst_55 = arith.constant 9.99999974E-6 : f32
    %113 = vector.broadcast %cst_55 : f32 to vector<1x128xf32>
    %114 = arith.addf %108, %113 : vector<1x128xf32>
    %115 = math.rsqrt %114 : vector<1x128xf32>
    %116 = vector.broadcast %115 : vector<1x128xf32> to vector<8x128xf32>
    %117 = arith.mulf %112, %116 : vector<8x128xf32>
    %118 = vector.broadcast %95 : vector<1x128xf32> to vector<8x128xf32>
    %119 = arith.addf %117, %118 : vector<8x128xf32>
    %120 = arith.addf %119, %11 : vector<8x128xf32>
    %cst_56 = arith.constant 0.000000e+00 : f32
    %121 = vector.broadcast %cst_56 : f32 to vector<8x128xf32>
    %122 = arith.cmpf ogt, %120, %121 : vector<8x128xf32>
    %123 = math.exp %120 : vector<8x128xf32>
    %cst_57 = arith.constant 1.000000e+00 : f32
    %124 = vector.broadcast %cst_57 : f32 to vector<8x128xf32>
    %125 = arith.subf %123, %124 : vector<8x128xf32>
    %126 = arith.select %122, %120, %125 : vector<8x128xi1>, vector<8x128xf32>
    %127 = arith.truncf %126 : vector<8x128xf32> to vector<8x128xbf16>
    %c0_58 = arith.constant 0 : index
    %c0_59 = arith.constant 0 : index
    %128 = vector.load %arg15[%c0_58, %c0_59] : memref<128x128xbf16, #tpu.memory_space<vmem>>, vector<128x128xbf16>
    %cst_60 = arith.constant dense<0.000000e+00> : vector<8x128xf32>
    %129 = tpu.matmul %127, %128, %cst_60 {dimension_numbers = #tpu.dot_dimension_numbers<[1], [0], [0], [1], [0, 0, 1, 1], [], []>} : vector<8x128xbf16>, vector<128x128xbf16>, vector<8x128xf32> -> vector<8x128xf32>
    %c0_61 = arith.constant 0 : index
    %c0_62 = arith.constant 0 : index
    %130 = vector.load %arg16[%c0_61, %c0_62] : memref<1x128xf32, #tpu.memory_space<vmem>>, vector<1x128xf32>
    %131 = vector.broadcast %130 : vector<1x128xf32> to vector<8x128xf32>
    %132 = arith.addf %129, %131 : vector<8x128xf32>
    %133 = vector.shape_cast %132 : vector<8x128xf32> to vector<1x8x128xf32>
    %cst_63 = arith.constant dense<0.000000e+00> : vector<1xf32>
    %134 = vector.multi_reduction <add>, %133, %cst_63 [1, 2] : vector<1x8x128xf32> to vector<1xf32>
    %135 = vector.shape_cast %134 : vector<1xf32> to vector<1x1x1xf32>
    %136 = vector.extract %135[0, 0, 0] : f32 from vector<1x1x1xf32>
    %cst_64 = arith.constant 2.560000e+02 : f32
    %137 = arith.divf %136, %cst_64 : f32
    %138 = arith.mulf %132, %132 : vector<8x128xf32>
    %139 = vector.shape_cast %138 : vector<8x128xf32> to vector<1x8x128xf32>
    %cst_65 = arith.constant dense<0.000000e+00> : vector<1xf32>
    %140 = vector.multi_reduction <add>, %139, %cst_65 [1, 2] : vector<1x8x128xf32> to vector<1xf32>
    %141 = vector.shape_cast %140 : vector<1xf32> to vector<1x1x1xf32>
    %142 = vector.extract %141[0, 0, 0] : f32 from vector<1x1x1xf32>
    %cst_66 = arith.constant 2.560000e+02 : f32
    %143 = arith.divf %142, %cst_66 : f32
    %144 = arith.mulf %137, %137 : f32
    %145 = arith.subf %143, %144 : f32
    %cst_67 = arith.constant 0.000000e+00 : f32
    %146 = arith.maximumf %145, %cst_67 : f32
    %c0_68 = arith.constant 0 : index
    %c0_69 = arith.constant 0 : index
    %147 = memref.load %arg17[%c0_68, %c0_69] : memref<1x1xf32, #tpu.memory_space<smem>>
    %c0_70 = arith.constant 0 : index
    %c0_71 = arith.constant 0 : index
    %148 = memref.load %arg18[%c0_70, %c0_71] : memref<1x1xf32, #tpu.memory_space<smem>>
    %149 = vector.broadcast %137 : f32 to vector<8x128xf32>
    %150 = arith.subf %132, %149 : vector<8x128xf32>
    %151 = vector.broadcast %147 : f32 to vector<8x128xf32>
    %152 = arith.mulf %151, %150 : vector<8x128xf32>
    %cst_72 = arith.constant 9.99999974E-6 : f32
    %153 = arith.addf %146, %cst_72 : f32
    %154 = math.rsqrt %153 : f32
    %155 = vector.broadcast %154 : f32 to vector<8x128xf32>
    %156 = arith.mulf %152, %155 : vector<8x128xf32>
    %157 = vector.broadcast %148 : f32 to vector<8x128xf32>
    %158 = arith.addf %156, %157 : vector<8x128xf32>
    %c0_73 = arith.constant 0 : index
    %c0_74 = arith.constant 0 : index
    %159 = vector.load %arg19[%c0_73, %c0_74] : memref<8x128xf32, #tpu.memory_space<vmem>>, vector<8x128xf32>
    tpu.vector_store %arg19[%c0_73, %c0_74], %158 {strides = array<i32>} : memref<8x128xf32, #tpu.memory_space<vmem>>, vector<8x128xf32>,
    return
  }
}

</mosaic_0001>

<bundles_post_ra>
// kernel: tpu_custom_call.1
= control target key start
LH: loop header
LB: loop body
LE: loop exit
PB: predicated region body
PF: predicated region fallthrough
CT: control target
= control target key end

     0   :  { %s2073_s0 = inlined_call_operand.hbm [shape: bf16[8,128], index: 0, kind: input, shape index: {}]   ;;  %s2074_s1 = inlined_call_operand.hbm [shape: bf16[128,128], index: 1, kind: input, shape index: {}]   ;;  %s2075_s2 = inlined_call_operand.hbm [shape: f32[1,128], index: 2, kind: input, shape index: {}]   ;;  %s2076_s3 = inlined_call_operand.hbm [shape: bf16[128,128], index: 3, kind: input, shape index: {}]   ;;  %s2077_s4 = inlined_call_operand.hbm [shape: f32[1,128], index: 4, kind: input, shape index: {}]   ;;  %s2078_s5 = inlined_call_operand.hbm [shape: f32[1,128], index: 5, kind: input, shape index: {}]   ;;  %s2079_s6 = inlined_call_operand.hbm [shape: f32[1,128], index: 6, kind: input, shape index: {}]   ;;  %s2080_s7 = inlined_call_operand.hbm [shape: bf16[128,128], index: 7, kind: input, shape index: {}]   ;;  %s2081_s8 = inlined_call_operand.hbm [shape: f32[1,128], index: 8, kind: input, shape index: {}]   ;;  %s2082_s9 = inlined_call_operand.hbm [shape: f32[1,128], index: 9, kind: input, shape index: {}]   ;;  %s2083_s10 = inlined_call_operand.hbm [shape: f32[1,128], index: 10, kind: input, shape index: {}]   ;;  %s2084_s11 = inlined_call_operand.hbm [shape: bf16[128,128], index: 11, kind: input, shape index: {}]   ;;  %s2085_s12 = inlined_call_operand.hbm [shape: f32[1,128], index: 12, kind: input, shape index: {}]   ;;  %s2086_s13 = inlined_call_operand.hbm [shape: f32[1,128], index: 13, kind: input, shape index: {}]   ;;  %s2087_s14 = inlined_call_operand.hbm [shape: f32[1,128], index: 14, kind: input, shape index: {}]   ;;  %s2088_s15 = inlined_call_operand.vmem [shape: bf16[128,128], index: 15, kind: input, shape index: {}]   ;;  %s2089_s16 = inlined_call_operand.vmem [shape: f32[1,128], index: 16, kind: input, shape index: {}]   ;;  %s2090_s17 = inlined_call_operand.<no memory space> [shape: f32[1,1], index: 17, kind: input, shape index: {}]   ;;  %s2091_s18 = inlined_call_operand.<no memory space> [shape: f32[1,1], index: 18, kind: input, shape index: {}]   ;;  %s2092_s19 = inlined_call_operand.hbm [shape: f32[8,128], index: 19, kind: output, shape index: {}]  }
   0x1   :  { %2098 = sst [smem:[#allocation38_spill]] %s2073_s0 }
   0x2   :  { %2099 = sst [smem:[#allocation39_spill]] %s2074_s1 }
   0x3   :  { %2100 = sst [smem:[#allocation40_spill]] %s2075_s2 }
   0x4   :  { %2101 = sst [smem:[#allocation41_spill]] %s2076_s3 }
   0x5   :  { %2102 = sst [smem:[#allocation42_spill]] %s2090_s17 }
   0x6   :  { %2103 = sst [smem:[#allocation43_spill]] %s2091_s18 }
   0x7   :  { %2104 = sst [smem:[#allocation44_spill]] %s2092_s19 }
   0x8   :  { %26 = vsyncpa [#allocation5], 0 }
   0x9   :  { %27 = vsyncpa [#allocation8], 0 }
   0xa   :  { %28 = vsyncpa [#allocation11], 0 }
   0xb   :  { %29 = vsyncpa [#allocation14], 0 }
   0xc   :  { %30 = vsyncpa [#allocation17], 0 }
   0xd   :  { %31 = vsyncpa [#allocation20], 0 }
   0xe   :  { %32 = vsyncpa [#allocation23], 0 }
   0xf   :  { %33 = vsyncpa [#allocation26], 0 }
  0x10   :  { %34 = vsyncpa [#allocation6], 0  ;;  %s1660_s0 = smov [#allocation7]   ;;  %s2105_s1 = sld [smem:[#allocation39_spill]] }
  0x11   :  { %s50_s30 = sshll.u32 %s1660_s0, 4  ;;  %s51_s30 = int_to_ptr.vmem [resolvable:$true] %s50_s30 }
  0x16   :  { %s1290_s22 = scalar_lea.hbm %s2105_s1, 1024 }
  0x17   :  { %p1291_p0 = scmp.ne.s32.totalorder %s2105_s1, %s1290_s22  ;;  %p1294_p1 = scmp.lt.u32.totalorder %s1290_s22, %s2105_s1 }
  0x19   :  { %p1296_p2 = pnand %p1294_p1, %p1291_p0 }
  0x1b   :  { %1299 = shalt.err (!%p1296_p2)
}
  0x1c   :  { %s1300_s3 = scalar_lea.vmem %s51_s30, 1024  ;;  %p1305_p4 = scmp.lt.s32.totalorder %s51_s30, %s51_s30 }
  0x1d   :  { %p1301_p3 = scmp.ne.s32.totalorder %s51_s30, %s1300_s3  ;;  %p1306_p5 = scmp.lt.s32.totalorder %s1300_s3, %s1300_s3 }
  0x1f   :  { %p1307_p6 = por %p1306_p5, %p1305_p4 }
  0x21   :  { %p1308_p7 = pnand %p1307_p6, %p1301_p3 }
  0x23   :  { %1311 = shalt.err (!%p1308_p7)
}
  0x24   :  { %s1661_s26 = smov 64   ;;  %s1662_s27 = smov 4  }
  0x25   :  { %56 = dma.hbm_to_vmem [thread:$0]  %s2105_s1, 1024, %s51_s30, [#allocation8], %s1661_s26, %s1661_s26, %s1662_s27  }
  0x26   :  { %s1663_s0 = smov [#allocation10]   ;;  %s1664_s21 = smov [#allocation13]  }
  0x27   :  { %s72_s20 = sshll.u32 %s1663_s0, 4  ;;  %s95_s22 = sshll.u32 %s1664_s21, 4  ;;  %s73_s20 = int_to_ptr.vmem [resolvable:$true] %s72_s20  ;;  %s96_s22 = int_to_ptr.vmem [resolvable:$true] %s95_s22 }
  0x28   :  { %s2106_s24 = sld [smem:[#allocation41_spill]] }
  0x2e   :  { %s1312_s25 = scalar_lea.hbm %s2106_s24, 1024 }
  0x2f   :  { %p1313_p8 = scmp.ne.s32.totalorder %s2106_s24, %s1312_s25  ;;  %p1316_p9 = scmp.lt.u32.totalorder %s1312_s25, %s2106_s24 }
  0x31   :  { %p1318_p10 = pnand %p1316_p9, %p1313_p8 }
  0x33   :  { %1321 = shalt.err (!%p1318_p10)
}
  0x34   :  { %s1322_s30 = scalar_lea.vmem %s73_s20, 1024  ;;  %p1327_p12 = scmp.lt.s32.totalorder %s73_s20, %s73_s20 }
  0x35   :  { %p1323_p11 = scmp.ne.s32.totalorder %s73_s20, %s1322_s30  ;;  %p1328_p13 = scmp.lt.s32.totalorder %s1322_s30, %s1322_s30 }
  0x37   :  { %p1329_p0 = por %p1328_p13, %p1327_p12 }
  0x39   :  { %p1330_p1 = pnand %p1329_p0, %p1323_p11 }
  0x3b   :  { %1333 = shalt.err (!%p1330_p1)
}
  0x3c   :  { %78 = dma.hbm_to_vmem [thread:$0]  %s2106_s24, 1024, %s73_s20, [#allocation11], %s1661_s26, %s1661_s26, %s1662_s27  }
  0x3d   :  { %s1334_s18 = scalar_lea.hbm %s2078_s5, 16 }
  0x3e   :  { %p1335_p2 = scmp.ne.s32.totalorder %s2078_s5, %s1334_s18  ;;  %p1338_p3 = scmp.lt.u32.totalorder %s1334_s18, %s2078_s5 }
  0x40   :  { %p1340_p4 = pnand %p1338_p3, %p1335_p2 }
  0x42   :  { %1343 = shalt.err (!%p1340_p4)
}
  0x43   :  { %s1344_s23 = scalar_lea.vmem %s96_s22, 16  ;;  %s1348_s25 = scalar_lea.vmem %s96_s22, 32 }
  0x44   :  { %p1345_p5 = scmp.ne.s32.totalorder %s96_s22, %s1344_s23  ;;  %p1349_p6 = scmp.lt.s32.totalorder %s96_s22, %s96_s22 }
  0x45   :  { %p1350_p7 = scmp.lt.s32.totalorder %s1348_s25, %s1344_s23 }
  0x47   :  { %p1351_p8 = por %p1350_p7, %p1349_p6 }
  0x49   :  { %p1352_p9 = pnand %p1351_p8, %p1345_p5 }
  0x4b   :  { %1355 = shalt.err (!%p1352_p9)
}
  0x4c   :  { %98 = dma.hbm_to_vmem [thread:$0]  %s2078_s5, 16, %s96_s22, [#allocation14]  }
  0x4d   :  { %s1665_s3 = smov [#allocation16]   ;;  %s1666_s1 = smov [#allocation19]  }
  0x4e   :  { %s114_s30 = sshll.u32 %s1665_s3, 4  ;;  %s137_s28 = sshll.u32 %s1666_s1, 4  ;;  %s115_s30 = int_to_ptr.vmem [resolvable:$true] %s114_s30  ;;  %s138_s28 = int_to_ptr.vmem [resolvable:$true] %s137_s28 }
  0x4f   :  { %s1356_s18 = scalar_lea.hbm %s2080_s7, 1024 }
  0x50   :  { %p1357_p10 = scmp.ne.s32.totalorder %s2080_s7, %s1356_s18  ;;  %p1360_p11 = scmp.lt.u32.totalorder %s1356_s18, %s2080_s7 }
  0x52   :  { %p1362_p12 = pnand %p1360_p11, %p1357_p10 }
  0x54   :  { %1365 = shalt.err (!%p1362_p12)
}
  0x55   :  { %s1366_s5 = scalar_lea.vmem %s115_s30, 1024  ;;  %p1371_p0 = scmp.lt.s32.totalorder %s115_s30, %s115_s30 }
  0x56   :  { %p1367_p13 = scmp.ne.s32.totalorder %s115_s30, %s1366_s5  ;;  %p1372_p1 = scmp.lt.s32.totalorder %s1366_s5, %s1366_s5 }
  0x58   :  { %p1373_p2 = por %p1372_p1, %p1371_p0 }
  0x5a   :  { %p1374_p3 = pnand %p1373_p2, %p1367_p13 }
  0x5c   :  { %1377 = shalt.err (!%p1374_p3)
}
  0x5d   :  { %120 = dma.hbm_to_vmem [thread:$0]  %s2080_s7, 1024, %s115_s30, [#allocation17], %s1661_s26, %s1661_s26, %s1662_s27  }
  0x5e   :  { %s1378_s24 = scalar_lea.hbm %s2082_s9, 16 }
  0x5f   :  { %p1379_p4 = scmp.ne.s32.totalorder %s2082_s9, %s1378_s24  ;;  %p1382_p5 = scmp.lt.u32.totalorder %s1378_s24, %s2082_s9 }
  0x61   :  { %p1384_p6 = pnand %p1382_p5, %p1379_p4 }
  0x63   :  { %1387 = shalt.err (!%p1384_p6)
}
  0x64   :  { %s1388_s18 = scalar_lea.vmem %s138_s28, 16  ;;  %s1392_s29 = scalar_lea.vmem %s138_s28, 32 }
  0x65   :  { %p1389_p7 = scmp.ne.s32.totalorder %s138_s28, %s1388_s18  ;;  %p1393_p8 = scmp.lt.s32.totalorder %s138_s28, %s138_s28 }
  0x66   :  { %p1394_p9 = scmp.lt.s32.totalorder %s1392_s29, %s1388_s18 }
  0x68   :  { %p1395_p10 = por %p1394_p9, %p1393_p8 }
  0x6a   :  { %p1396_p11 = pnand %p1395_p10, %p1389_p7 }
  0x6c   :  { %1399 = shalt.err (!%p1396_p11)
}
  0x6d   :  { %140 = dma.hbm_to_vmem [thread:$0]  %s2082_s9, 16, %s138_s28, [#allocation20]  }
  0x6e   :  { %s1667_s0 = smov [#allocation22]   ;;  %s1668_s2 = smov [#allocation25]  }
  0x6f   :  { %s156_s21 = sshll.u32 %s1667_s0, 4  ;;  %s179_s5 = sshll.u32 %s1668_s2, 4  ;;  %s157_s21 = int_to_ptr.vmem [resolvable:$true] %s156_s21  ;;  %s180_s5 = int_to_ptr.vmem [resolvable:$true] %s179_s5 }
  0x70   :  { %s1400_s25 = scalar_lea.hbm %s2084_s11, 1024 }
  0x71   :  { %p1401_p12 = scmp.ne.s32.totalorder %s2084_s11, %s1400_s25  ;;  %p1404_p13 = scmp.lt.u32.totalorder %s1400_s25, %s2084_s11 }
  0x73   :  { %p1406_p0 = pnand %p1404_p13, %p1401_p12 }
  0x75   :  { %1409 = shalt.err (!%p1406_p0)
}
  0x76   :  { %s1410_s9 = scalar_lea.vmem %s157_s21, 1024  ;;  %p1415_p2 = scmp.lt.s32.totalorder %s157_s21, %s157_s21 }
  0x77   :  { %p1411_p1 = scmp.ne.s32.totalorder %s157_s21, %s1410_s9  ;;  %p1416_p3 = scmp.lt.s32.totalorder %s1410_s9, %s1410_s9 }
  0x79   :  { %p1417_p4 = por %p1416_p3, %p1415_p2 }
  0x7b   :  { %p1418_p5 = pnand %p1417_p4, %p1411_p1 }
  0x7d   :  { %1421 = shalt.err (!%p1418_p5)
}
  0x7e   :  { %162 = dma.hbm_to_vmem [thread:$0]  %s2084_s11, 1024, %s157_s21, [#allocation23], %s1661_s26, %s1661_s26, %s1662_s27  }
  0x7f   :  { %s1422_s29 = scalar_lea.hbm %s2086_s13, 16 }
  0x80   :  { %p1423_p6 = scmp.ne.s32.totalorder %s2086_s13, %s1422_s29  ;;  %p1426_p7 = scmp.lt.u32.totalorder %s1422_s29, %s2086_s13 }
  0x82   :  { %p1428_p8 = pnand %p1426_p7, %p1423_p6 }
  0x84   :  { %1431 = shalt.err (!%p1428_p8)
}
  0x85   :  { %s1432_s22 = scalar_lea.vmem %s180_s5, 16  ;;  %s1436_s23 = scalar_lea.vmem %s180_s5, 32 }
  0x86   :  { %p1433_p9 = scmp.ne.s32.totalorder %s180_s5, %s1432_s22  ;;  %p1437_p10 = scmp.lt.s32.totalorder %s180_s5, %s180_s5 }
  0x87   :  { %p1438_p11 = scmp.lt.s32.totalorder %s1436_s23, %s1432_s22 }
  0x89   :  { %p1439_p12 = por %p1438_p11, %p1437_p10 }
  0x8b   :  { %p1440_p13 = pnand %p1439_p12, %p1433_p9 }
  0x8d   :  { %1443 = shalt.err (!%p1440_p13)
}
  0x8e   :  { %182 = dma.hbm_to_vmem [thread:$0]  %s2086_s13, 16, %s180_s5, [#allocation26]  }
  0x8f   :  { %s1669_s27 = smov [#allocation4]   ;;  %s1670_s25 = smov [#allocation9]  }
  0x90   :  { %s41_s21 = sshll.u32 %s1669_s27, 4  ;;  %s63_s20 = sshll.u32 %s1670_s25, 4  ;;  %s42_s21 = int_to_ptr.vmem [resolvable:$true] %s41_s21  ;;  %s64_s20 = int_to_ptr.vmem [resolvable:$true] %s63_s20 }
  0x91   :  { %s2107_s1 = sld [smem:[#allocation38_spill]] }
  0x97   :  { %s1444_s9 = scalar_lea.hbm %s2107_s1, 64 }
  0x98   :  { %p1445_p0 = scmp.ne.s32.totalorder %s2107_s1, %s1444_s9  ;;  %p1448_p1 = scmp.lt.u32.totalorder %s1444_s9, %s2107_s1 }
  0x9a   :  { %p1450_p2 = pnand %p1448_p1, %p1445_p0 }
  0x9c   :  { %1453 = shalt.err (!%p1450_p2)
}
  0x9d   :  { %s1454_s13 = scalar_lea.vmem %s42_s21, 64  ;;  %p1459_p4 = scmp.lt.s32.totalorder %s42_s21, %s42_s21 }
  0x9e   :  { %p1455_p3 = scmp.ne.s32.totalorder %s42_s21, %s1454_s13  ;;  %p1460_p5 = scmp.lt.s32.totalorder %s1454_s13, %s1454_s13 }
  0xa0   :  { %p1461_p6 = por %p1460_p5, %p1459_p4 }
  0xa2   :  { %p1462_p7 = pnand %p1461_p6, %p1455_p3 }
  0xa4   :  { %1465 = shalt.err (!%p1462_p7)
}
  0xa5   :  { %44 = dma.hbm_to_vmem [thread:$0]  %s2107_s1, 64, %s42_s21, [#allocation5]  }
  0xa6   :  { %s2108_s0 = sld [smem:[#allocation40_spill]] }
  0xac   :  { %s1466_s2 = scalar_lea.hbm %s2108_s0, 16 }
  0xad   :  { %p1467_p8 = scmp.ne.s32.totalorder %s2108_s0, %s1466_s2  ;;  %p1470_p9 = scmp.lt.u32.totalorder %s1466_s2, %s2108_s0 }
  0xaf   :  { %p1472_p10 = pnand %p1470_p9, %p1467_p8 }
  0xb1   :  { %1475 = shalt.err (!%p1472_p10)
}
  0xb2   :  { %s1476_s27 = scalar_lea.vmem %s64_s20, 16  ;;  %s1480_s25 = scalar_lea.vmem %s64_s20, 32 }
  0xb3   :  { %p1477_p11 = scmp.ne.s32.totalorder %s64_s20, %s1476_s27  ;;  %p1481_p12 = scmp.lt.s32.totalorder %s64_s20, %s64_s20 }
  0xb4   :  { %p1482_p13 = scmp.lt.s32.totalorder %s1480_s25, %s1476_s27 }
  0xb6   :  { %p1483_p0 = por %p1482_p13, %p1481_p12 }
  0xb8   :  { %p1484_p1 = pnand %p1483_p0, %p1477_p11 }
  0xba   :  { %1487 = shalt.err (!%p1484_p1)
}
  0xbb   :  { %66 = dma.hbm_to_vmem [thread:$0]  %s2108_s0, 16, %s64_s20, [#allocation8]  }
  0xbc   :  { %s1671_s3 = smov [#allocation12]   ;;  %s1672_s9 = smov [#allocation15]  }
  0xbd   :  { %s85_s1 = sshll.u32 %s1671_s3, 4  ;;  %s105_s28 = sshll.u32 %s1672_s9, 4  ;;  %s86_s1 = int_to_ptr.vmem [resolvable:$true] %s85_s1  ;;  %s106_s28 = int_to_ptr.vmem [resolvable:$true] %s105_s28 }
  0xbe   :  { %s1488_s18 = scalar_lea.hbm %s2077_s4, 16 }
  0xbf   :  { %p1489_p2 = scmp.ne.s32.totalorder %s2077_s4, %s1488_s18  ;;  %p1492_p3 = scmp.lt.u32.totalorder %s1488_s18, %s2077_s4 }
  0xc1   :  { %p1494_p4 = pnand %p1492_p3, %p1489_p2 }
  0xc3   :  { %1497 = shalt.err (!%p1494_p4)
}
  0xc4   :  { %s1498_s20 = scalar_lea.vmem %s86_s1, 16  ;;  %s1502_s30 = scalar_lea.vmem %s86_s1, 32 }
  0xc5   :  { %p1499_p5 = scmp.ne.s32.totalorder %s86_s1, %s1498_s20  ;;  %p1503_p6 = scmp.lt.s32.totalorder %s86_s1, %s86_s1 }
  0xc6   :  { %p1504_p7 = scmp.lt.s32.totalorder %s1502_s30, %s1498_s20 }
  0xc8   :  { %p1505_p8 = por %p1504_p7, %p1503_p6 }
  0xca   :  { %p1506_p9 = pnand %p1505_p8, %p1499_p5 }
  0xcc   :  { %1509 = shalt.err (!%p1506_p9)
}
  0xcd   :  { %88 = dma.hbm_to_vmem [thread:$0]  %s2077_s4, 16, %s86_s1, [#allocation11]  }
  0xce   :  { %s1510_s11 = scalar_lea.hbm %s2079_s6, 16 }
  0xcf   :  { %p1511_p10 = scmp.ne.s32.totalorder %s2079_s6, %s1510_s11  ;;  %p1514_p11 = scmp.lt.u32.totalorder %s1510_s11, %s2079_s6 }
  0xd1   :  { %p1516_p12 = pnand %p1514_p11, %p1511_p10 }
  0xd3   :  { %1519 = shalt.err (!%p1516_p12)
}
  0xd4   :  { %s1520_s24 = scalar_lea.vmem %s106_s28, 16  ;;  %s1524_s3 = scalar_lea.vmem %s106_s28, 32 }
  0xd5   :  { %p1521_p13 = scmp.ne.s32.totalorder %s106_s28, %s1520_s24  ;;  %p1525_p0 = scmp.lt.s32.totalorder %s106_s28, %s106_s28 }
  0xd6   :  { %p1526_p1 = scmp.lt.s32.totalorder %s1524_s3, %s1520_s24 }
  0xd8   :  { %p1527_p2 = por %p1526_p1, %p1525_p0 }
  0xda   :  { %p1528_p3 = pnand %p1527_p2, %p1521_p13 }
  0xdc   :  { %1531 = shalt.err (!%p1528_p3)
}
  0xdd   :  { %108 = dma.hbm_to_vmem [thread:$0]  %s2079_s6, 16, %s106_s28, [#allocation14]  }
  0xde   :  { %s1673_s9 = smov [#allocation18]   ;;  %s1674_s17 = smov [#allocation21]  }
  0xdf   :  { %s127_s19 = sshll.u32 %s1673_s9, 4  ;;  %s147_s18 = sshll.u32 %s1674_s17, 4  ;;  %s128_s19 = int_to_ptr.vmem [resolvable:$true] %s127_s19  ;;  %s148_s18 = int_to_ptr.vmem [resolvable:$true] %s147_s18 }
  0xe0   :  { %s1532_s29 = scalar_lea.hbm %s2081_s8, 16 }
  0xe1   :  { %p1533_p4 = scmp.ne.s32.totalorder %s2081_s8, %s1532_s29  ;;  %p1536_p5 = scmp.lt.u32.totalorder %s1532_s29, %s2081_s8 }
  0xe3   :  { %p1538_p6 = pnand %p1536_p5, %p1533_p4 }
  0xe5   :  { %1541 = shalt.err (!%p1538_p6)
}
  0xe6   :  { %s1542_s6 = scalar_lea.vmem %s128_s19, 16  ;;  %s1546_s28 = scalar_lea.vmem %s128_s19, 32 }
  0xe7   :  { %p1543_p7 = scmp.ne.s32.totalorder %s128_s19, %s1542_s6  ;;  %p1547_p8 = scmp.lt.s32.totalorder %s128_s19, %s128_s19 }
  0xe8   :  { %p1548_p9 = scmp.lt.s32.totalorder %s1546_s28, %s1542_s6 }
  0xea   :  { %p1549_p10 = por %p1548_p9, %p1547_p8 }
  0xec   :  { %p1550_p11 = pnand %p1549_p10, %p1543_p7 }
  0xee   :  { %1553 = shalt.err (!%p1550_p11)
}
  0xef   :  { %130 = dma.hbm_to_vmem [thread:$0]  %s2081_s8, 16, %s128_s19, [#allocation17]  }
  0xf0   :  { %s1554_s26 = scalar_lea.hbm %s2083_s10, 16 }
  0xf1   :  { %p1555_p12 = scmp.ne.s32.totalorder %s2083_s10, %s1554_s26  ;;  %p1558_p13 = scmp.lt.u32.totalorder %s1554_s26, %s2083_s10 }
  0xf3   :  { %p1560_p0 = pnand %p1558_p13, %p1555_p12 }
  0xf5   :  { %1563 = shalt.err (!%p1560_p0)
}
  0xf6   :  { %s1564_s3 = scalar_lea.vmem %s148_s18, 16  ;;  %s1568_s4 = scalar_lea.vmem %s148_s18, 32 }
  0xf7   :  { %p1565_p1 = scmp.ne.s32.totalorder %s148_s18, %s1564_s3  ;;  %p1569_p2 = scmp.lt.s32.totalorder %s148_s18, %s148_s18 }
  0xf8   :  { %p1570_p3 = scmp.lt.s32.totalorder %s1568_s4, %s1564_s3 }
  0xfa   :  { %p1571_p4 = por %p1570_p3, %p1569_p2 }
  0xfc   :  { %p1572_p5 = pnand %p1571_p4, %p1565_p1 }
  0xfe   :  { %1575 = shalt.err (!%p1572_p5)
}
  0xff   :  { %150 = dma.hbm_to_vmem [thread:$0]  %s2083_s10, 16, %s148_s18, [#allocation20]  }
 0x100   :  { %s1675_s9 = smov [#allocation24]   ;;  %s1676_s17 = smov [#allocation27]  }
 0x101   :  { %s169_s19 = sshll.u32 %s1675_s9, 4  ;;  %s189_s13 = sshll.u32 %s1676_s17, 4  ;;  %s170_s19 = int_to_ptr.vmem [resolvable:$true] %s169_s19  ;;  %s190_s13 = int_to_ptr.vmem [resolvable:$true] %s189_s13 }
 0x102   :  { %s1576_s7 = scalar_lea.hbm %s2085_s12, 16 }
 0x103   :  { %p1577_p6 = scmp.ne.s32.totalorder %s2085_s12, %s1576_s7  ;;  %p1580_p7 = scmp.lt.u32.totalorder %s1576_s7, %s2085_s12 }
 0x105   :  { %p1582_p8 = pnand %p1580_p7, %p1577_p6 }
 0x107   :  { %1585 = shalt.err (!%p1582_p8)
}
 0x108   :  { %s1586_s10 = scalar_lea.vmem %s170_s19, 16  ;;  %s1590_s18 = scalar_lea.vmem %s170_s19, 32 }
 0x109   :  { %p1587_p9 = scmp.ne.s32.totalorder %s170_s19, %s1586_s10  ;;  %p1591_p10 = scmp.lt.s32.totalorder %s170_s19, %s170_s19 }
 0x10a   :  { %p1592_p11 = scmp.lt.s32.totalorder %s1590_s18, %s1586_s10 }
 0x10c   :  { %p1593_p12 = por %p1592_p11, %p1591_p10 }
 0x10e   :  { %p1594_p13 = pnand %p1593_p12, %p1587_p9 }
 0x110   :  { %1597 = shalt.err (!%p1594_p13)
}
 0x111   :  { %172 = dma.hbm_to_vmem [thread:$0]  %s2085_s12, 16, %s170_s19, [#allocation23]  }
 0x112   :  { %s1598_s11 = scalar_lea.hbm %s2087_s14, 16 }
 0x113   :  { %p1599_p0 = scmp.ne.s32.totalorder %s2087_s14, %s1598_s11  ;;  %p1602_p1 = scmp.lt.u32.totalorder %s1598_s11, %s2087_s14 }
 0x115   :  { %p1604_p2 = pnand %p1602_p1, %p1599_p0 }
 0x117   :  { %1607 = shalt.err (!%p1604_p2)
}
 0x118   :  { %s1608_s24 = scalar_lea.vmem %s190_s13, 16  ;;  %s1612_s3 = scalar_lea.vmem %s190_s13, 32 }
 0x119   :  { %p1609_p3 = scmp.ne.s32.totalorder %s190_s13, %s1608_s24  ;;  %p1613_p4 = scmp.lt.s32.totalorder %s190_s13, %s190_s13 }
 0x11a   :  { %p1614_p5 = scmp.lt.s32.totalorder %s1612_s3, %s1608_s24 }
 0x11c   :  { %p1615_p6 = por %p1614_p5, %p1613_p4 }
 0x11e   :  { %p1616_p7 = pnand %p1615_p6, %p1609_p3 }
 0x120   :  { %1619 = shalt.err (!%p1616_p7)
}
 0x121   :  { %192 = dma.hbm_to_vmem [thread:$0]  %s2087_s14, 16, %s190_s13, [#allocation26]  }
 0x122   :  { %1642 = dma.done.wait [#allocation5], 64  }
 0x123   :  { %1643 = vsyncadd [#allocation5], 4294967232 }
 0x124   :  { %1644 = dma.done.wait [#allocation8], 1040  }
 0x125   :  { %1645 = vsyncadd [#allocation8], 4294966256 }
 0x126   :  { %1646 = dma.done.wait [#allocation11], 1040  }
 0x127   :  { %1647 = vsyncadd [#allocation11], 4294966256 }
 0x128   :  { %1648 = dma.done.wait [#allocation14], 32  }
 0x129   :  { %1649 = vsyncadd [#allocation14], 4294967264 }
 0x12a   :  { %1650 = dma.done.wait [#allocation17], 1040  }
 0x12b   :  { %1651 = vsyncadd [#allocation17], 4294966256 }
 0x12c   :  { %1652 = dma.done.wait [#allocation20], 32  }
 0x12d   :  { %1653 = vsyncadd [#allocation20], 4294967264 }
 0x12e   :  { %1654 = dma.done.wait [#allocation23], 1040  }
 0x12f   :  { %1655 = vsyncadd [#allocation23], 4294966256 }
 0x130   :  { %1656 = dma.done.wait [#allocation26], 32  }
 0x131   :  { %1657 = vsyncadd [#allocation26], 4294967264  ;;  %v1677_v0 = vmov 0.0   ;;  %vm1678_vm0 = vmmov 0   ;;  %v1234_v1 = vld [vmem:[#allocation7] sm:$0xff]   ;;  %v1235_v2 = vld [vmem:[#allocation7 + $0x8] sm:$0xff]  }
 0x132   :  { %1107 = vmatprep.subr.bf16.mxu0 %v1677_v0  ;;  %1123 = vmatprep.mubr.msk.bf16.mxu0 %vm1678_vm0, %v1677_v0  ;;  %v1236_v3 = vld [vmem:[#allocation7 + $0x10] sm:$0xff]   ;;  %v1242_v4 = vld [vmem:[#allocation10] sm:$0xff]   ;;  %v1237_v5 = vld [vmem:[#allocation7 + $0x18] sm:$0xff]   ;;  %s1679_s27 = smov 0.0   ;;  %s2109_s12 = sld [smem:[#allocation42_spill]] }
 0x133   :  { %1127 = vmatprep.subr.bf16.mxu1 %v1677_v0  ;;  %1143 = vmatprep.mubr.msk.bf16.mxu1 %vm1678_vm0, %v1677_v0  ;;  %v1243_v6 = vld [vmem:[#allocation10 + $0x8] sm:$0xff]   ;;  %v1238_v7 = vld [vmem:[#allocation7 + $0x20] sm:$0xff]   ;;  %v1244_v8 = vld [vmem:[#allocation10 + $0x10] sm:$0xff]   ;;  %s2110_s1 = sld [smem:[#allocation43_spill]]  ;;  %s1680_s9 = smov [#allocation28]  }
 0x134   :  { %1108 = vmatpush3.bf16.msra.mxu0 %v1234_v1  ;;  %1128 = vmatpush3.bf16.msra.mxu1 %v1242_v4  ;;  %v1239_v9 = vld [vmem:[#allocation7 + $0x28] sm:$0xff]   ;;  %v1240_v10 = vld [vmem:[#allocation7 + $0x30] sm:$0xff]   ;;  %v1241_v11 = vld [vmem:[#allocation7 + $0x38] sm:$0xff]   ;;  %s991_s19 = sshll.u32 %s1680_s9, 4  ;;  %s992_s19 = int_to_ptr.vmem [resolvable:$true] %s991_s19 }
 0x135   :  { %1109 = vmatprep.subr.bf16.mxu0 %v1677_v0  ;;  %1129 = vmatprep.subr.bf16.mxu1 %v1677_v0  ;;  %v247_v12 = vld [vmem:[#allocation4] sm:$0xf]  ;;  %v1246_v14 = vld [vmem:[#allocation10 + $0x20] sm:$0xff]   ;;  %v1247_v15 = vld [vmem:[#allocation10 + $0x28] sm:$0xff]   ;;  %s1620_s17 = scalar_lea.vmem %s992_s19, 128  ;;  %p1625_p9 = scmp.lt.s32.totalorder %s992_s19, %s992_s19 }
 0x136   :  { %v1245_v13 = vld [vmem:[#allocation10 + $0x18] sm:$0xff]   ;;  %v1248_v16 = vld [vmem:[#allocation10 + $0x30] sm:$0xff]   ;;  %v1250_v29 = vld [vmem:[#allocation16] sm:$0xff]   ;;  %p1621_p8 = scmp.ne.s32.totalorder %s992_s19, %s1620_s17  ;;  %p1626_p10 = scmp.lt.s32.totalorder %s1620_s17, %s1620_s17 }
 0x137   :  { %v1249_v17 = vld [vmem:[#allocation10 + $0x38] sm:$0xff]   ;;  %v1251_v30 = vld [vmem:[#allocation16 + $0x8] sm:$0xff]   ;;  %v1254_v33 = vld [vmem:[#allocation16 + $0x20] sm:$0xff]  }
 0x138   :  { %1110 = vmatpush3.bf16.msra.mxu0 %v1235_v2  ;;  %1130 = vmatpush3.bf16.msra.mxu1 %v1243_v6  ;;  %v1007_v18 = vld [vmem:[#allocation9] ss:$0 sm:$0xff]  ;;  %v1252_v31 = vld [vmem:[#allocation16 + $0x10] sm:$0xff]   ;;  %v1255_v34 = vld [vmem:[#allocation16 + $0x28] sm:$0xff]   ;;  %p1627_p11 = por %p1626_p10, %p1625_p9 }
 0x139   :  { %1111 = vmatprep.subr.bf16.mxu0 %v1677_v0  ;;  %1131 = vmatprep.subr.bf16.mxu1 %v1677_v0  ;;  %v1253_v32 = vld [vmem:[#allocation16 + $0x18] sm:$0xff]   ;;  %v1256_v35 = vld [vmem:[#allocation16 + $0x30] sm:$0xff]  }
 0x13a   :  { %v1257_v36 = vld [vmem:[#allocation16 + $0x38] sm:$0xff]   ;;  %p1628_p12 = pnand %p1627_p11, %p1621_p8 }
 0x13b   :  { %v1017_v37 = vld [vmem:[#allocation12] ss:$0 sm:$0xff]  ;;  %v1026_v63 = vld [vmem:[#allocation13] ss:$0 sm:$0xff] }
 0x13c   :  { %1112 = vmatpush3.bf16.msra.mxu0 %v1236_v3  ;;  %1132 = vmatpush3.bf16.msra.mxu1 %v1244_v8  ;;  %v1027_v3 = vld [vmem:[#allocation15] ss:$0 sm:$0xff] }
 0x13d   :  { %1113 = vmatprep.subr.bf16.mxu0 %v1677_v0  ;;  %1133 = vmatprep.subr.bf16.mxu1 %v1677_v0 }
 0x140   :  { %1114 = vmatpush3.bf16.msra.mxu0 %v1237_v5  ;;  %1134 = vmatpush3.bf16.msra.mxu1 %v1245_v13  ;;  %v1260_v13 = vld [vmem:[#allocation22 + $0x10] sm:$0xff]  }
 0x141   :  { %1115 = vmatprep.subr.bf16.mxu0 %v1677_v0  ;;  %1135 = vmatprep.subr.bf16.mxu1 %v1677_v0 }
 0x144   :  { %1116 = vmatpush3.bf16.msra.mxu0 %v1238_v7  ;;  %1136 = vmatpush3.bf16.msra.mxu1 %v1246_v14  ;;  %v1261_v14 = vld [vmem:[#allocation22 + $0x18] sm:$0xff]  }
 0x145   :  { %1117 = vmatprep.subr.bf16.mxu0 %v1677_v0  ;;  %1137 = vmatprep.subr.bf16.mxu1 %v1677_v0 }
 0x148   :  { %1118 = vmatpush3.bf16.msra.mxu0 %v1239_v9  ;;  %1138 = vmatpush3.bf16.msra.mxu1 %v1247_v15  ;;  %v1262_v15 = vld [vmem:[#allocation22 + $0x20] sm:$0xff]  }
 0x149   :  { %1119 = vmatprep.subr.bf16.mxu0 %v1677_v0  ;;  %1139 = vmatprep.subr.bf16.mxu1 %v1677_v0 }
 0x14c   :  { %1120 = vmatpush3.bf16.msra.mxu0 %v1240_v10  ;;  %1140 = vmatpush3.bf16.msra.mxu1 %v1248_v16  ;;  %v1263_v16 = vld [vmem:[#allocation22 + $0x28] sm:$0xff]  }
 0x14d   :  { %1121 = vmatprep.subr.bf16.mxu0 %v1677_v0  ;;  %1141 = vmatprep.subr.bf16.mxu1 %v1677_v0 }
 0x150   :  { %1122 = vmatpush3.bf16.msra.mxu0 %v1241_v11  ;;  %1142 = vmatpush3.bf16.msra.mxu1 %v1249_v17  ;;  %v1258_v11 = vld [vmem:[#allocation22] sm:$0xff]   ;;  %v1264_v17 = vld [vmem:[#allocation22 + $0x30] sm:$0xff]  }
 0x151   :  { %1147 = vmatprep.subr.bf16.mxu0 %v1677_v0  ;;  %1167 = vmatprep.subr.bf16.mxu1 %v1677_v0 }
 0x153   :  { %1124 = vmatmul.mubr.bf16.vlgmr.msra.gmra.mrb[0].mxu0 %v247_v12  ;;  %v1259_v12 = vld [vmem:[#allocation22 + $0x8] sm:$0xff]  }
 0x154   :  { %1163 = vmatprep.mubr.msk.bf16.mxu0 %vm1678_vm0, %v1677_v0  ;;  %1148 = vmatpush3.bf16.msra.mxu0 %v1250_v29 }
 0x155   :  { %1149 = vmatprep.subr.bf16.mxu0 %v1677_v0 }
 0x158   :  { %1150 = vmatpush3.bf16.msra.mxu0 %v1251_v30 }
 0x159   :  { %1151 = vmatprep.subr.bf16.mxu0 %v1677_v0 }
 0x15c   :  { %1152 = vmatpush3.bf16.msra.mxu0 %v1252_v31 }
 0x15d   :  { %1153 = vmatprep.subr.bf16.mxu0 %v1677_v0 }
 0x160   :  { %1154 = vmatpush3.bf16.msra.mxu0 %v1253_v32 }
 0x161   :  { %1155 = vmatprep.subr.bf16.mxu0 %v1677_v0 }
 0x164   :  { %1156 = vmatpush3.bf16.msra.mxu0 %v1254_v33 }
 0x165   :  { %1157 = vmatprep.subr.bf16.mxu0 %v1677_v0 }
 0x168   :  { %1158 = vmatpush3.bf16.msra.mxu0 %v1255_v34 }
 0x169   :  { %1159 = vmatprep.subr.bf16.mxu0 %v1677_v0 }
 0x16c   :  { %1160 = vmatpush3.bf16.msra.mxu0 %v1256_v35 }
 0x16d   :  { %1161 = vmatprep.subr.bf16.mxu0 %v1677_v0 }
 0x170   :  { %1162 = vmatpush3.bf16.msra.mxu0 %v1257_v36 }
 0x171   :  { %1187 = vmatprep.subr.bf16.mxu0 %v1677_v0 }
 0x226   :  { %v353_v19 = vpop.f32.mrb[0].mxu0 }
 0x227   :  { %v354_v20 = vadd.f32 %v1007_v18, %v353_v19  ;;  %v1125_v21 = vpop.f32.mrb[1].mxu0  ;;  %v1265_v18 = vld [vmem:[#allocation22 + $0x38] sm:$0xff]  }
 0x228   :  { %v356_v22 = vpop.f32.mrb[2].mxu0  ;;  %v1029_v19 = vld [vmem:[#allocation18] ss:$0 sm:$0xff] }
 0x229   :  { %v360_v23 = vmul.f32 1.442695, %v354_v20  ;;  %v1126_v24 = vpop.f32.mrb[3].mxu0  ;;  %vm359_vm1 = vcmp.gt.f32.partialorder %v354_v20, 0.0 }
 0x22b   :  { %1274 = vpow2.f32 %v360_v23 }
 0x235   :  { %v1275_v25 = vpop.eup %1274 }
 0x236   :  { %v1016_v26 = vadd.f32 -1.0, %v1275_v25 }
 0x238   :  { %v1997_v27 = vsel %vm359_vm1, %v354_v20, %v1016_v26 }
 0x239   :  { %v364_v28 = vpack.c.bf16 %v1997_v27, %v1997_v27 }
 0x23b   :  { %1144 = vmatmul.mubr.bf16.vlgmr.msra.gmra.mrb[0].mxu1 %v364_v28 }
 0x23c   :  { %1183 = vmatprep.mubr.msk.bf16.mxu1 %vm1678_vm0, %v1677_v0  ;;  %1168 = vmatpush3.bf16.msra.mxu1 %v1258_v11 }
 0x23d   :  { %1169 = vmatprep.subr.bf16.mxu1 %v1677_v0 }
 0x240   :  { %1170 = vmatpush3.bf16.msra.mxu1 %v1259_v12 }
 0x241   :  { %1171 = vmatprep.subr.bf16.mxu1 %v1677_v0 }
 0x244   :  { %1172 = vmatpush3.bf16.msra.mxu1 %v1260_v13 }
 0x245   :  { %1173 = vmatprep.subr.bf16.mxu1 %v1677_v0 }
 0x248   :  { %1174 = vmatpush3.bf16.msra.mxu1 %v1261_v14 }
 0x249   :  { %1175 = vmatprep.subr.bf16.mxu1 %v1677_v0 }
 0x24c   :  { %1176 = vmatpush3.bf16.msra.mxu1 %v1262_v15 }
 0x24d   :  { %1177 = vmatprep.subr.bf16.mxu1 %v1677_v0 }
 0x250   :  { %1178 = vmatpush3.bf16.msra.mxu1 %v1263_v16 }
 0x251   :  { %1179 = vmatprep.subr.bf16.mxu1 %v1677_v0 }
 0x254   :  { %1180 = vmatpush3.bf16.msra.mxu1 %v1264_v17 }
 0x255   :  { %1181 = vmatprep.subr.bf16.mxu1 %v1677_v0 }
 0x258   :  { %1182 = vmatpush3.bf16.msra.mxu1 %v1265_v18 }
 0x30e   :  { %v470_v38 = vpop.f32.mrb[0].mxu1 }
 0x30f   :  { %v471_v39 = vadd.f32 %v1017_v37, %v470_v38  ;;  %v1145_v40 = vpop.f32.mrb[1].mxu1 }
 0x310   :  { %v473_v41 = vpop.f32.mrb[2].mxu1 }
 0x311   :  { %v478_v42 = vrot.slane %v471_v39, 4  ;;  %v484_v43 = vmul.f32 %v471_v39, %v471_v39  ;;  %v1146_v44 = vpop.f32.mrb[3].mxu1 }
 0x313   :  { %v479_v45 = vadd.f32 %v478_v42, %v471_v39  ;;  %v485_v46 = vrot.slane %v484_v43, 4 }
 0x315   :  { %v480_v47 = vrot.slane %v479_v45, 2  ;;  %v486_v48 = vadd.f32 %v485_v46, %v484_v43  ;;  %v1038_v46 = vld [vmem:[#allocation19] ss:$0 sm:$0xff] }
 0x317   :  { %v481_v49 = vadd.f32 %v480_v47, %v479_v45  ;;  %v487_v50 = vrot.slane %v486_v48, 2 }
 0x319   :  { %v482_v51 = vrot.slane %v481_v49, 1  ;;  %v488_v52 = vadd.f32 %v487_v50, %v486_v48 }
 0x31b   :  { %v483_v53 = vadd.f32 %v482_v51, %v481_v49  ;;  %v489_v54 = vrot.slane %v488_v52, 1  ;;  %v1039_v49 = vld [vmem:[#allocation21] ss:$0 sm:$0xff] }
 0x31d   :  { %v490_v55 = vadd.f32 %v489_v54, %v488_v52  ;;  %v491_v56 = vmul.f32 0.125, %v483_v53 }
 0x31f   :  { %v492_v57 = vmul.f32 0.125, %v490_v55  ;;  %v493_v58 = vmul.f32 %v491_v56, %v491_v56  ;;  %v496_v62 = vsub.f32 %v471_v39, %v491_v56 }
 0x321   :  { %v494_v59 = vsub.f32 %v492_v57, %v493_v58  ;;  %v503_v1 = vmul.f32 %v1026_v63, %v496_v62  ;;  %v1266_v57 = vld [vmem:[%s2088_s15] sm:$0xff]   ;;  %v1267_v58 = vld [vmem:[%s2088_s15 + $0x8] sm:$0xff]   ;;  %v1272_v63 = vld [vmem:[%s2088_s15 + $0x30] sm:$0xff]  }
 0x322   :  { %v1271_v62 = vld [vmem:[%s2088_s15 + $0x28] sm:$0xff]  }
 0x323   :  { %v495_v60 = vmax.f32 %v494_v59, 0.0  ;;  %v1268_v59 = vld [vmem:[%s2088_s15 + $0x10] sm:$0xff]  }
 0x325   :  { %v504_v61 = vadd.f32 1e-05, %v495_v60  ;;  %v1269_v60 = vld [vmem:[%s2088_s15 + $0x18] sm:$0xff]  }
 0x327   :  { %1276 = vrsqrt.f32 %v504_v61  ;;  %v1270_v61 = vld [vmem:[%s2088_s15 + $0x20] sm:$0xff]  }
 0x331   :  { %v1277_v2 = vpop.eup %1276 }
 0x332   :  { %v506_v4 = vmul.f32 %v1277_v2, %v503_v1  ;;  %v1273_v1 = vld [vmem:[%s2088_s15 + $0x38] sm:$0xff]   ;;  %v1041_v2 = vld [vmem:[#allocation24] ss:$0 sm:$0xff] }
 0x334   :  { %v513_v5 = vadd.f32 %v1027_v3, %v506_v4 }
 0x336   :  { %v515_v6 = vmul.f32 1.442695, %v513_v5  ;;  %vm514_vm2 = vcmp.gt.f32.partialorder %v513_v5, 0.0 }
 0x338   :  { %1278 = vpow2.f32 %v515_v6 }
 0x342   :  { %v1279_v7 = vpop.eup %1278 }
 0x343   :  { %v1028_v8 = vadd.f32 -1.0, %v1279_v7 }
 0x345   :  { %v518_v9 = vsel %vm514_vm2, %v513_v5, %v1028_v8 }
 0x346   :  { %v519_v10 = vpack.c.bf16 %v518_v9, %v518_v9 }
 0x348   :  { %1164 = vmatmul.mubr.bf16.vlgmr.msra.gmra.mrb[4].mxu0 %v519_v10 }
 0x349   :  { %1203 = vmatprep.mubr.msk.bf16.mxu0 %vm1678_vm0, %v1677_v0  ;;  %1188 = vmatpush3.bf16.msra.mxu0 %v1266_v57 }
 0x34a   :  { %1189 = vmatprep.subr.bf16.mxu0 %v1677_v0 }
 0x34d   :  { %1190 = vmatpush3.bf16.msra.mxu0 %v1267_v58 }
 0x34e   :  { %1191 = vmatprep.subr.bf16.mxu0 %v1677_v0 }
 0x351   :  { %1192 = vmatpush3.bf16.msra.mxu0 %v1268_v59 }
 0x352   :  { %1193 = vmatprep.subr.bf16.mxu0 %v1677_v0 }
 0x355   :  { %1194 = vmatpush3.bf16.msra.mxu0 %v1269_v60 }
 0x356   :  { %1195 = vmatprep.subr.bf16.mxu0 %v1677_v0 }
 0x359   :  { %1196 = vmatpush3.bf16.msra.mxu0 %v1270_v61 }
 0x35a   :  { %1197 = vmatprep.subr.bf16.mxu0 %v1677_v0 }
 0x35d   :  { %1198 = vmatpush3.bf16.msra.mxu0 %v1271_v62 }
 0x35e   :  { %1199 = vmatprep.subr.bf16.mxu0 %v1677_v0 }
 0x361   :  { %1200 = vmatpush3.bf16.msra.mxu0 %v1272_v63 }
 0x362   :  { %1201 = vmatprep.subr.bf16.mxu0 %v1677_v0 }
 0x365   :  { %1202 = vmatpush3.bf16.msra.mxu0 %v1273_v1  ;;  %v974_v1 = vstv %s2109_s12 }
 0x41b   :  { %v625_v20 = vpop.f32.mrb[4].mxu0 }
 0x41c   :  { %v626_v21 = vadd.f32 %v1029_v19, %v625_v20  ;;  %v1165_v22 = vpop.f32.mrb[5].mxu0 }
 0x41d   :  { %v628_v23 = vpop.f32.mrb[6].mxu0 }
 0x41e   :  { %v633_v24 = vrot.slane %v626_v21, 4  ;;  %v639_v25 = vmul.f32 %v626_v21, %v626_v21  ;;  %v1166_v26 = vpop.f32.mrb[7].mxu0 }
 0x420   :  { %v634_v28 = vadd.f32 %v633_v24, %v626_v21  ;;  %v640_v29 = vrot.slane %v639_v25, 4 }
 0x422   :  { %v635_v30 = vrot.slane %v634_v28, 2  ;;  %v641_v31 = vadd.f32 %v640_v29, %v639_v25 }
 0x424   :  { %v636_v32 = vadd.f32 %v635_v30, %v634_v28  ;;  %v642_v33 = vrot.slane %v641_v31, 2  ;;  %v1050_v28 = vld [vmem:[#allocation25] ss:$0 sm:$0xff] }
 0x426   :  { %v637_v34 = vrot.slane %v636_v32, 1  ;;  %v643_v35 = vadd.f32 %v642_v33, %v641_v31  ;;  %v1051_v31 = vld [vmem:[#allocation27] ss:$0 sm:$0xff] }
 0x428   :  { %v638_v36 = vadd.f32 %v637_v34, %v636_v32  ;;  %v644_v37 = vrot.slane %v643_v35, 1 }
 0x42a   :  { %v645_v38 = vadd.f32 %v644_v37, %v643_v35  ;;  %v646_v39 = vmul.f32 0.125, %v638_v36 }
 0x42c   :  { %v647_v40 = vmul.f32 0.125, %v645_v38  ;;  %v648_v41 = vmul.f32 %v646_v39, %v646_v39  ;;  %v651_v45 = vsub.f32 %v626_v21, %v646_v39 }
 0x42e   :  { %v649_v42 = vsub.f32 %v647_v40, %v648_v41  ;;  %v658_v47 = vmul.f32 %v1038_v46, %v651_v45  ;;  %v1053_v40 = vld [vmem:[%s2089_s16] ss:$0 sm:$0xff] }
 0x430   :  { %v650_v43 = vmax.f32 %v649_v42, 0.0 }
 0x432   :  { %v659_v44 = vadd.f32 1e-05, %v650_v43 }
 0x434   :  { %1280 = vrsqrt.f32 %v659_v44 }
 0x43e   :  { %v1281_v48 = vpop.eup %1280 }
 0x43f   :  { %v661_v50 = vmul.f32 %v1281_v48, %v658_v47 }
 0x441   :  { %v668_v51 = vadd.f32 %v1039_v49, %v661_v50 }
 0x443   :  { %v670_v52 = vmul.f32 1.442695, %v668_v51  ;;  %vm669_vm3 = vcmp.gt.f32.partialorder %v668_v51, 0.0 }
 0x445   :  { %1282 = vpow2.f32 %v670_v52 }
 0x44f   :  { %v1283_v53 = vpop.eup %1282 }
 0x450   :  { %v1040_v54 = vadd.f32 -1.0, %v1283_v53 }
 0x452   :  { %v673_v55 = vsel %vm669_vm3, %v668_v51, %v1040_v54 }
 0x453   :  { %v674_v56 = vpack.c.bf16 %v673_v55, %v673_v55 }
 0x455   :  { %1184 = vmatmul.mubr.bf16.vlgmr.msra.gmra.mrb[4].mxu1 %v674_v56 }
 0x528   :  { %v780_v3 = vpop.f32.mrb[4].mxu1 }
 0x529   :  { %v781_v4 = vadd.f32 %v1041_v2, %v780_v3  ;;  %v1185_v5 = vpop.f32.mrb[5].mxu1 }
 0x52a   :  { %v783_v6 = vpop.f32.mrb[6].mxu1 }
 0x52b   :  { %v788_v7 = vrot.slane %v781_v4, 4  ;;  %v794_v8 = vmul.f32 %v781_v4, %v781_v4  ;;  %v1186_v9 = vpop.f32.mrb[7].mxu1 }
 0x52d   :  { %v789_v10 = vadd.f32 %v788_v7, %v781_v4  ;;  %v795_v11 = vrot.slane %v794_v8, 4 }
 0x52f   :  { %v790_v12 = vrot.slane %v789_v10, 2  ;;  %v796_v13 = vadd.f32 %v795_v11, %v794_v8 }
 0x531   :  { %v791_v14 = vadd.f32 %v790_v12, %v789_v10  ;;  %v797_v15 = vrot.slane %v796_v13, 2 }
 0x533   :  { %v792_v16 = vrot.slane %v791_v14, 1  ;;  %v798_v17 = vadd.f32 %v797_v15, %v796_v13 }
 0x535   :  { %v793_v18 = vadd.f32 %v792_v16, %v791_v14  ;;  %v799_v19 = vrot.slane %v798_v17, 1 }
 0x537   :  { %v800_v0 = vadd.f32 %v799_v19, %v798_v17  ;;  %v801_v20 = vmul.f32 0.125, %v793_v18 }
 0x539   :  { %v802_v21 = vmul.f32 0.125, %v800_v0  ;;  %v803_v22 = vmul.f32 %v801_v20, %v801_v20  ;;  %v806_v26 = vsub.f32 %v781_v4, %v801_v20  ;;  %v982_v4 = vstv %s2110_s1 }
 0x53b   :  { %v804_v23 = vsub.f32 %v802_v21, %v803_v22  ;;  %v813_v29 = vmul.f32 %v1050_v28, %v806_v26 }
 0x53d   :  { %v805_v24 = vmax.f32 %v804_v23, 0.0 }
 0x53f   :  { %v814_v25 = vadd.f32 1e-05, %v805_v24 }
 0x541   :  { %1284 = vrsqrt.f32 %v814_v25 }
 0x54b   :  { %v1285_v30 = vpop.eup %1284 }
 0x54c   :  { %v816_v32 = vmul.f32 %v1285_v30, %v813_v29 }
 0x54e   :  { %v823_v33 = vadd.f32 %v1051_v31, %v816_v32 }
 0x550   :  { %v824_v34 = vadd.f32 %v823_v33, %v1997_v27 }
 0x552   :  { %v826_v35 = vmul.f32 1.442695, %v824_v34  ;;  %vm825_vm4 = vcmp.gt.f32.partialorder %v824_v34, 0.0 }
 0x554   :  { %1286 = vpow2.f32 %v826_v35 }
 0x55e   :  { %v1287_v36 = vpop.eup %1286 }
 0x55f   :  { %v1052_v37 = vadd.f32 -1.0, %v1287_v36 }
 0x561   :  { %v829_v38 = vsel %vm825_vm4, %v824_v34, %v1052_v37 }
 0x562   :  { %v830_v39 = vpack.c.bf16 %v829_v38, %v829_v38 }
 0x564   :  { %1204 = vmatmul.mubr.bf16.vlgmr.msra.gmra.mrb[8].mxu0 %v830_v39 }
 0x637   :  { %v936_v41 = vpop.f32.mrb[8].mxu0 }
 0x638   :  { %v937_v42 = vadd.f32 %v1053_v40, %v936_v41  ;;  %v1205_v43 = vpop.f32.mrb[9].mxu0 }
 0x639   :  { %v939_v44 = vpop.f32.mrb[10].mxu0 }
 0x63a   :  { %942 = vadd.xlane.f32.xlu0 %v937_v42  ;;  %v1206_v45 = vpop.f32.mrb[11].mxu0  ;;  %v954_v46 = vmul.f32 %v937_v42, %v937_v42 }
 0x63e   :  { %955 = vadd.xlane.f32.xlu0 %v954_v46 }
 0x6c7   :  { %v943_v27 = vpop.xlane.xlu0 %942 }
 0x6c8   :  { %v944_v47 = vrot.slane %v943_v27, 4 }
 0x6ca   :  { %v945_v48 = vadd.f32 %v944_v47, %v943_v27 }
 0x6cb   :  { %v956_v49 = vpop.xlane.xlu0 %955 }
 0x6cc   :  { %v946_v50 = vrot.slane %v945_v48, 2  ;;  %v957_v51 = vrot.slane %v956_v49, 4 }
 0x6ce   :  { %v958_v52 = vadd.f32 %v957_v51, %v956_v49  ;;  %v947_v53 = vadd.f32 %v946_v50, %v945_v48 }
 0x6d0   :  { %v959_v54 = vrot.slane %v958_v52, 2  ;;  %v948_v55 = vrot.slane %v947_v53, 1 }
 0x6d2   :  { %v960_v56 = vadd.f32 %v959_v54, %v958_v52  ;;  %v949_v57 = vadd.f32 %v948_v55, %v947_v53 }
 0x6d4   :  { %1207 = vpush %v949_v57  ;;  %v961_v58 = vrot.slane %v960_v56, 1 }
 0x6d6   :  { %v962_v59 = vadd.f32 %v961_v58, %v960_v56 }
 0x6d8   :  { %1209 = vpush %v962_v59 }
 0x705   :  { %s1208_s16 = spop %1207 }
 0x706   :  { %s953_s2 = smul.f32 0.00390625, %s1208_s16 }
 0x708   :  { %s967_s22 = smul.f32 %s953_s2, %s953_s2  ;;  %v972_v62 = vstv %s953_s2 }
 0x709   :  { %s1210_s23 = spop %1209  ;;  %v973_v63 = vsub.f32 %v937_v42, %v972_v62 }
 0x70a   :  { %s966_s11 = smul.f32 0.00390625, %s1210_s23 }
 0x70b   :  { %v975_v2 = vmul.f32 %v974_v1, %v973_v63 }
 0x70c   :  { %s968_s26 = ssub.f32 %s966_s11, %s967_s22 }
 0x70e   :  { %s969_s25 = smax.f32 %s1679_s27, %s968_s26 }
 0x70f   :  { %s976_s21 = sadd.f32 1e-05, %s969_s25 }
 0x711   :  { %v977_v60 = vstv %s976_s21 }
 0x712   :  { %1288 = vrsqrt.f32 %v977_v60 }
 0x71c   :  { %v1289_v61 = vpop.eup %1288 }
 0x71d   :  { %1211 = vpush %v1289_v61 }
 0x74e   :  { %s1212_s4 = spop %1211 }
 0x74f   :  { %v980_v3 = vstv %s1212_s4 }
 0x750   :  { %v981_v5 = vmul.f32 %v980_v3, %v975_v2 }
 0x752   :  { %v983_v6 = vadd.f32 %v982_v4, %v981_v5 }
 0x754   :  { %984 = vst [vmem:[#allocation28] sm:$0xff] %v983_v6 }
 0x755   :  { %1631 = shalt.err (!%p1628_p12)
}
 0x756   :  { %s2111_s29 = sld [smem:[#allocation44_spill]] }
 0x75c   :  { %s1632_s7 = scalar_lea.hbm %s2111_s29, 128 }
 0x75d   :  { %p1633_p13 = scmp.ne.s32.totalorder %s2111_s29, %s1632_s7  ;;  %p1636_p0 = scmp.lt.u32.totalorder %s1632_s7, %s2111_s29 }
 0x75f   :  { %p1638_p1 = pnand %p1636_p0, %p1633_p13 }
 0x761   :  { %1641 = shalt.err (!%p1638_p1)
}
 0x762   :  { %994 = dma.vmem_to_hbm [thread:$0]  %s992_s19, 128, %s2111_s29, [#allocation6]  }
 0x763   :  { %1658 = dma.done.wait [#allocation6], 128  }
 0x764   :  { %1659 = vsyncadd [#allocation6], 4294967168 }
 0x765   :  { %998 = vsyncpa [#allocation5], 1 }
 0x766   :  { %999 = vsyncpa [#allocation8], 1 }
 0x767   :  { %1000 = vsyncpa [#allocation11], 1 }
 0x768   :  { %1001 = vsyncpa [#allocation14], 1 }
 0x769   :  { %1002 = vsyncpa [#allocation17], 1 }
 0x76a   :  { %1003 = vsyncpa [#allocation20], 1 }
 0x76b   :  { %1004 = vsyncpa [#allocation23], 1 }
 0x76c   :  { %1005 = vsyncpa [#allocation26], 1 }
 0x76d   :  { %1006 = vsyncpa [#allocation6], 1 }

</bundles_post_ra>
